<compile_context>
chip_gen: v6e
topology: v6e:2x2x1
jax: 0.10.0
libtpu: 0.0.40
codegen_flags: <defaults>
</compile_context>

<pallas_src>
import math
import numpy as np
import jax
import jax.numpy as jnp
from jax.experimental import pallas as pl
from jax.experimental.pallas import tpu as pltpu


# ---------------------------------------------------------------------------
# helpers
# ---------------------------------------------------------------------------
def _bilinear_matrix(out_size, in_size):
    """1-D bilinear interpolation matrix, align_corners=True (PyTorch)."""
    A = np.zeros((out_size, in_size), np.float32)
    for i in range(out_size):
        src = 0.0 if out_size == 1 else i * (in_size - 1) / (out_size - 1)
        h0 = min(int(math.floor(src)), in_size - 1)
        h1 = min(h0 + 1, in_size - 1)
        frac = src - h0
        A[i, h0] += 1.0 - frac
        A[i, h1] += frac
    return A


def _tile_and_pad_nc(x_lane_last, bytes_per_col, target_bytes=4 << 20):
    """Pick the lane (last-dim) tile and pad NC up to a multiple of it.

    Per-input-buffer budget ~4 MiB -> double-buffered input ~8 MiB, well under
    the 16 MiB (v5e) / 32 MiB (v6e/v7x) scoped-VMEM limits and v7x's 64 MiB
    physical VMEM, while tiles stay large enough (>=128 lanes) for the HBM
    roofline.
    """
    nc = x_lane_last.shape[-1]
    if nc <= 256:
        return x_lane_last, nc                    # single full-dim block
    tile = (target_bytes // max(bytes_per_col, 1)) // 128 * 128
    tile = int(max(128, min(tile, 2048)))
    pad = (-nc) % tile
    if pad:
        cfg = [(0, 0)] * (x_lane_last.ndim - 1) + [(0, pad)]
        x_lane_last = jnp.pad(x_lane_last, cfg)
    return x_lane_last, tile


_COMPILER_PARAMS = pltpu.CompilerParams(
    dimension_semantics=("parallel",),            # shard NC across TCs on v7x
    vmem_limit_bytes=32 * 1024 * 1024,
)


# ---------------------------------------------------------------------------
# Kernel 1: max-pool, stride 1, no padding.  Layout (H, W, NC_tile).
#   Separable running max with doubling window sizes: ~ceil(log2(k)) maxima per
#   axis.  H-axis slices are major-dim (free); W-axis slices are sublane-only.
# ---------------------------------------------------------------------------
def _maxpool_kernel(x_ref, o_ref):
    h, w, _ = x_ref.shape
    gh, gw, _ = o_ref.shape
    k = h - gh + 1                                 # == w - gw + 1

    cur = x_ref[...]                               # window size 1 along H
    size = 1
    while size < k:                                # doubling max along H (axis 0)
        step = min(size, k - size)
        cur = jnp.maximum(cur[: cur.shape[0] - step], cur[step:])
        size += step
    # cur: (gh, w, tile_nc)
    size = 1
    while size < k:                                # doubling max along W (axis 1)
        step = min(size, k - size)
        cur = jnp.maximum(cur[:, : cur.shape[1] - step], cur[:, step:])
        size += step
    o_ref[...] = cur                               # (gh, gw, tile_nc) lane-dense store


def _maxpool_pallas(x_hwnc, gh, gw, tile_nc):
    h, w, nc_p = x_hwnc.shape
    grid = (nc_p // tile_nc,)
    return pl.pallas_call(
        _maxpool_kernel,
        out_shape=jax.ShapeDtypeStruct((gh, gw, nc_p), x_hwnc.dtype),
        grid_spec=pl.GridSpec(
            grid=grid,
            in_specs=[pl.BlockSpec((h, w, tile_nc), lambda i: (0, 0, i))],
            out_specs=pl.BlockSpec((gh, gw, tile_nc), lambda i: (0, 0, i)),
        ),
        compiler_params=_COMPILER_PARAMS,
    )(x_hwnc)


# ---------------------------------------------------------------------------
# Kernel 2: bilinear up-sampling (align_corners=True) as ONE matmul:
#   out(Gh*Gw, NC_tile) = kron(A, B)(Gh*Gw, H*W) @ x(H*W, NC_tile)
# NC is the MXU N dimension (lane-dense).  The tiny weight matrix uses a
# constant index_map so it stays resident in VMEM across all grid steps.
# ---------------------------------------------------------------------------
def _bilinear_kernel(m_ref, x_ref, o_ref):
    x = x_ref[...].astype(jnp.float32)             # (H*W, tile_nc)
    m = m_ref[...]                                 # (Gh*Gw, H*W), f32
    o_ref[...] = jnp.dot(m, x, preferred_element_type=jnp.float32).astype(o_ref.dtype)


def _bilinear_pallas(x_flat, m_mat, gh, gw, tile_nc):
    hw, nc_p = x_flat.shape
    ghgw = gh * gw
    grid = (nc_p // tile_nc,)
    return pl.pallas_call(
        _bilinear_kernel,
        out_shape=jax.ShapeDtypeStruct((ghgw, nc_p), x_flat.dtype),
        grid_spec=pl.GridSpec(
            grid=grid,
            in_specs=[
                pl.BlockSpec((ghgw, hw), lambda i: (0, 0)),      # weight: resident
                pl.BlockSpec((hw, tile_nc), lambda i: (0, i)),   # activations
            ],
            out_specs=pl.BlockSpec((ghgw, tile_nc), lambda i: (0, i)),
        ),
        compiler_params=_COMPILER_PARAMS,
    )(m_mat, x_flat)


# ---------------------------------------------------------------------------
# Wrapper reproducing PatchSlicing.forward  (layout plumbing lives here)
# ---------------------------------------------------------------------------
def patch_slicing(x, grid_size=8):
    n, c, h, w = x.shape
    if h == grid_size:
        return x

    nc = n * c
    dsize = jnp.dtype(x.dtype).itemsize
    # (N, C, H, W) -> (H, W, N*C): big N*C dim on the 128-lane axis.
    x_hwnc = jnp.transpose(x.reshape(nc, h, w), (1, 2, 0))

    if h > grid_size:
        k = h - grid_size + 1                      # max_pool2d kernel (stride 1, pad 0)
        gh, gw = h - k + 1, w - k + 1              # gh == grid_size
        assert gw >= 1, "max-pool window larger than input width"
        x_hwnc, tile_nc = _tile_and_pad_nc(x_hwnc, h * w * dsize)
        out_hwnc = _maxpool_pallas(x_hwnc, gh, gw, tile_nc)
    else:
        scale = grid_size / h                      # F.interpolate(scale_factor=...)
        gh = int(math.floor(h * scale))
        gw = int(math.floor(w * scale))
        m_mat = jnp.asarray(
            np.kron(_bilinear_matrix(gh, h), _bilinear_matrix(gw, w)))  # (gh*gw, h*w)
        x_hwnc, tile_nc = _tile_and_pad_nc(x_hwnc, h * w * dsize)
        x_flat = x_hwnc.reshape(h * w, -1)
        out_hwnc = _bilinear_pallas(x_flat, m_mat, gh, gw, tile_nc).reshape(gh, gw, -1)

    out_hwnc = out_hwnc[:, :, :nc]                 # drop NC padding (if any)
    return jnp.transpose(out_hwnc, (2, 0, 1)).reshape(n, c, gh, gw)


if __name__ == "__main__":
    key = jax.random.PRNGKey(0)
    k1, k2 = jax.random.split(key)

    # --- case 1: H (=16) > grid_size (=8)  -> max-pool path --------------------
    x = jax.random.normal(k1, (2, 4, 16, 16), dtype=jnp.float32)
    y = jax.block_until_ready(patch_slicing(x, grid_size=8))
    assert y.shape == (2, 4, 8, 8), y.shape

    # numpy reference for max_pool2d(kernel=9, stride=1)
    xnp = np.asarray(x).reshape(8, 16, 16)
    k = 16 - 8 + 1
    ref = np.full((8, 8, 8), -np.inf, np.float32)
    for di in range(k):
        for dj in range(k):
            ref = np.maximum(ref, xnp[:, di:di + 8, dj:dj + 8])
    np.testing.assert_allclose(np.asarray(y).reshape(8, 8, 8), ref, rtol=0, atol=0)

    # --- case 2: H (=4) < grid_size (=8)  -> bilinear path ---------------------
    x_small = jax.random.normal(k2, (2, 4, 4, 4), dtype=jnp.float32)
    y_small = jax.block_until_ready(patch_slicing(x_small, grid_size=8))
    assert y_small.shape == (2, 4, 8, 8), y_small.shape

    # numpy reference: per-pixel bilinear gather/blend, align_corners=True
    xs = np.asarray(x_small).reshape(8, 4, 4)
    ref2 = np.zeros((8, 8, 8), np.float32)
    for i in range(8):
        for j in range(8):
            si = i * (4 - 1) / (8 - 1)
            sj = j * (4 - 1) / (8 - 1)
            i0, j0 = int(math.floor(si)), int(math.floor(sj))
            i1, j1 = min(i0 + 1, 3), min(j0 + 1, 3)
            fi, fj = si - i0, sj - j0
            ref2[:, i, j] = ((1 - fi) * (1 - fj) * xs[:, i0, j0]
                             + (1 - fi) * fj * xs[:, i0, j1]
                             + fi * (1 - fj) * xs[:, i1, j0]
                             + fi * fj * xs[:, i1, j1])
    np.testing.assert_allclose(np.asarray(y_small).reshape(8, 8, 8), ref2,
                               rtol=1e-5, atol=1e-5)

    # --- case 3: larger N*C to exercise the tiled/pipelined grid path ----------
    x_big = jax.random.normal(key, (4, 96, 16, 16), dtype=jnp.float32)  # NC=384>256
    y_big = jax.block_until_ready(patch_slicing(x_big, grid_size=8))
    assert y_big.shape == (4, 96, 8, 8), y_big.shape
    xb = np.asarray(x_big).reshape(384, 16, 16)
    refb = np.full((384, 8, 8), -np.inf, np.float32)
    for di in range(k):
        for dj in range(k):
            refb = np.maximum(refb, xb[:, di:di + 8, dj:dj + 8])
    np.testing.assert_allclose(np.asarray(y_big).reshape(384, 8, 8), refb,
                               rtol=0, atol=0)

    # --- case 4: identity path (H == grid_size) --------------------------------
    x_eq = jax.random.normal(k1, (2, 4, 8, 8), dtype=jnp.float32)
    y_eq = jax.block_until_ready(patch_slicing(x_eq, grid_size=8))
    np.testing.assert_allclose(np.asarray(y_eq), np.asarray(x_eq))

    print("KERNEL_OK")
</pallas_src>

<mosaic_0001>
module attributes {stable_mosaic.version = 11 : i64} {
  func.func @_maxpool_kernel(%arg0: i32, %arg1: memref<16x16x8xf32, #tpu.memory_space<vmem>>, %arg2: memref<8x8x8xf32, #tpu.memory_space<vmem>>) attributes {dimension_semantics = [#tpu.dimension_semantics<parallel>], iteration_bounds = array<i64: 1>, scalar_prefetch = 0 : i64, scratch_operands = 0 : i64, tpu.core_type = #tpu.core_type<tc>, window_params = [{transform_indices = @transform_0, window_bounds = array<i64: 16, 16, 8>}, {transform_indices = @transform_1, window_bounds = array<i64: 8, 8, 8>}]} {
    %c0 = arith.constant 0 : index
    %c0_0 = arith.constant 0 : index
    %c0_1 = arith.constant 0 : index
    %0 = vector.load %arg1[%c0, %c0_0, %c0_1] : memref<16x16x8xf32, #tpu.memory_space<vmem>>, vector<16x16x8xf32>
    %1 = vector.extract_strided_slice %0 {offsets = [0, 0, 0], sizes = [15, 16, 8], strides = [1, 1, 1]} : vector<16x16x8xf32> to vector<15x16x8xf32>
    %2 = vector.extract_strided_slice %0 {offsets = [1, 0, 0], sizes = [15, 16, 8], strides = [1, 1, 1]} : vector<16x16x8xf32> to vector<15x16x8xf32>
    %3 = arith.maximumf %1, %2 : vector<15x16x8xf32>
    %4 = vector.extract_strided_slice %3 {offsets = [0, 0, 0], sizes = [13, 16, 8], strides = [1, 1, 1]} : vector<15x16x8xf32> to vector<13x16x8xf32>
    %5 = vector.extract_strided_slice %3 {offsets = [2, 0, 0], sizes = [13, 16, 8], strides = [1, 1, 1]} : vector<15x16x8xf32> to vector<13x16x8xf32>
    %6 = arith.maximumf %4, %5 : vector<13x16x8xf32>
    %7 = vector.extract_strided_slice %6 {offsets = [0, 0, 0], sizes = [9, 16, 8], strides = [1, 1, 1]} : vector<13x16x8xf32> to vector<9x16x8xf32>
    %8 = vector.extract_strided_slice %6 {offsets = [4, 0, 0], sizes = [9, 16, 8], strides = [1, 1, 1]} : vector<13x16x8xf32> to vector<9x16x8xf32>
    %9 = arith.maximumf %7, %8 : vector<9x16x8xf32>
    %10 = vector.extract_strided_slice %9 {offsets = [0, 0, 0], sizes = [8, 16, 8], strides = [1, 1, 1]} : vector<9x16x8xf32> to vector<8x16x8xf32>
    %11 = vector.extract_strided_slice %9 {offsets = [1, 0, 0], sizes = [8, 16, 8], strides = [1, 1, 1]} : vector<9x16x8xf32> to vector<8x16x8xf32>
    %12 = arith.maximumf %10, %11 : vector<8x16x8xf32>
    %13 = vector.extract_strided_slice %12 {offsets = [0, 0, 0], sizes = [8, 15, 8], strides = [1, 1, 1]} : vector<8x16x8xf32> to vector<8x15x8xf32>
    %14 = vector.extract_strided_slice %12 {offsets = [0, 1, 0], sizes = [8, 15, 8], strides = [1, 1, 1]} : vector<8x16x8xf32> to vector<8x15x8xf32>
    %15 = arith.maximumf %13, %14 : vector<8x15x8xf32>
    %16 = vector.extract_strided_slice %15 {offsets = [0, 0, 0], sizes = [8, 13, 8], strides = [1, 1, 1]} : vector<8x15x8xf32> to vector<8x13x8xf32>
    %17 = vector.extract_strided_slice %15 {offsets = [0, 2, 0], sizes = [8, 13, 8], strides = [1, 1, 1]} : vector<8x15x8xf32> to vector<8x13x8xf32>
    %18 = arith.maximumf %16, %17 : vector<8x13x8xf32>
    %19 = vector.extract_strided_slice %18 {offsets = [0, 0, 0], sizes = [8, 9, 8], strides = [1, 1, 1]} : vector<8x13x8xf32> to vector<8x9x8xf32>
    %20 = vector.extract_strided_slice %18 {offsets = [0, 4, 0], sizes = [8, 9, 8], strides = [1, 1, 1]} : vector<8x13x8xf32> to vector<8x9x8xf32>
    %21 = arith.maximumf %19, %20 : vector<8x9x8xf32>
    %22 = vector.extract_strided_slice %21 {offsets = [0, 0, 0], sizes = [8, 8, 8], strides = [1, 1, 1]} : vector<8x9x8xf32> to vector<8x8x8xf32>
    %23 = vector.extract_strided_slice %21 {offsets = [0, 1, 0], sizes = [8, 8, 8], strides = [1, 1, 1]} : vector<8x9x8xf32> to vector<8x8x8xf32>
    %24 = arith.maximumf %22, %23 : vector<8x8x8xf32>
    %c0_2 = arith.constant 0 : index
    %c0_3 = arith.constant 0 : index
    %c0_4 = arith.constant 0 : index
    %25 = vector.load %arg2[%c0_2, %c0_3, %c0_4] : memref<8x8x8xf32, #tpu.memory_space<vmem>>, vector<8x8x8xf32>
    tpu.vector_store %arg2[%c0_2, %c0_3, %c0_4], %24 {strides = array<i32>} : memref<8x8x8xf32, #tpu.memory_space<vmem>>, vector<8x8x8xf32>,
    return
  }
  func.func @transform_0(%arg0: i32) -> (i32, i32, i32) {
    %c0_i32 = arith.constant 0 : i32
    %c0_i32_0 = arith.constant 0 : i32
    %c0_i32_1 = arith.constant 0 : i32
    return %c0_i32, %c0_i32_0, %arg0 : i32, i32, i32
  }
  func.func @transform_1(%arg0: i32) -> (i32, i32, i32) {
    %c0_i32 = arith.constant 0 : i32
    %c0_i32_0 = arith.constant 0 : i32
    %c0_i32_1 = arith.constant 0 : i32
    return %c0_i32, %c0_i32_0, %arg0 : i32, i32, i32
  }
}

</mosaic_0001>

<bundles_post_ra>
// kernel: tpu_custom_call.1
= control target key start
LH: loop header
LB: loop body
LE: loop exit
PB: predicated region body
PF: predicated region fallthrough
CT: control target
= control target key end

     0   :  { %vm147_vm0 = vcmask 1046528   ;;  %vm220_vm1 = vcmask 1045504   ;;  %s672_s0 = inlined_call_operand.vmem [shape: f32[16,16,8], index: 0, kind: input, shape index: {}]   ;;  %s673_s1 = inlined_call_operand.hbm [shape: f32[8,8,8], index: 1, kind: output, shape index: {}]  }
   0x1   :  { %v9_v0 = vld [vmem:[%s672_s0] sm:$0xff]  ;;  %v10_v1 = vld [vmem:[%s672_s0 + $0x8] sm:$0xff]  ;;  %v11_v2 = vld [vmem:[%s672_s0 + $0x10] sm:$0xff] }
   0x2   :  { %v12_v3 = vld [vmem:[%s672_s0 + $0x18] sm:$0xff]  ;;  %v13_v4 = vld [vmem:[%s672_s0 + $0x20] sm:$0xff]  ;;  %v14_v5 = vld [vmem:[%s672_s0 + $0x28] sm:$0xff]  ;;  %v41_v6 = vmax.f32 %v9_v0, %v11_v2 }
   0x3   :  { %v15_v7 = vld [vmem:[%s672_s0 + $0x30] sm:$0xff]  ;;  %v16_v8 = vld [vmem:[%s672_s0 + $0x38] sm:$0xff]  ;;  %v17_v9 = vld [vmem:[%s672_s0 + $0x40] sm:$0xff]  ;;  %v42_v10 = vmax.f32 %v10_v1, %v12_v3  ;;  %v43_v11 = vmax.f32 %v11_v2, %v13_v4  ;;  %v44_v15 = vmax.f32 %v12_v3, %v14_v5 }
   0x4   :  { %v18_v12 = vld [vmem:[%s672_s0 + $0x48] sm:$0xff]  ;;  %v19_v13 = vld [vmem:[%s672_s0 + $0x50] sm:$0xff]  ;;  %v20_v14 = vld [vmem:[%s672_s0 + $0x58] sm:$0xff]  ;;  %v45_v16 = vmax.f32 %v13_v4, %v15_v7  ;;  %v46_v17 = vmax.f32 %v14_v5, %v16_v8  ;;  %v47_v18 = vmax.f32 %v15_v7, %v17_v9 }
   0x5   :  { %v21_v19 = vld [vmem:[%s672_s0 + $0x60] sm:$0xff]  ;;  %v22_v20 = vld [vmem:[%s672_s0 + $0x68] sm:$0xff]  ;;  %v23_v21 = vld [vmem:[%s672_s0 + $0x70] sm:$0xff]  ;;  %v48_v22 = vmax.f32 %v16_v8, %v18_v12  ;;  %v49_v23 = vmax.f32 %v17_v9, %v19_v13  ;;  %v50_v24 = vmax.f32 %v18_v12, %v20_v14 }
   0x6   :  { %v24_v25 = vld [vmem:[%s672_s0 + $0x78] sm:$0xff]  ;;  %v25_v26 = vld [vmem:[%s672_s0 + $0x80] sm:$0xff]  ;;  %v26_v27 = vld [vmem:[%s672_s0 + $0x88] sm:$0xff]  ;;  %v51_v28 = vmax.f32 %v19_v13, %v21_v19  ;;  %v52_v29 = vmax.f32 %v20_v14, %v22_v20  ;;  %v53_v30 = vmax.f32 %v21_v19, %v23_v21  ;;  %v71_v31 = vmax.f32 %v41_v6, %v45_v16 }
   0x7   :  { %v54_v32 = vmax.f32 %v22_v20, %v24_v25  ;;  %v55_v33 = vmax.f32 %v23_v21, %v25_v26  ;;  %v56_v34 = vmax.f32 %v24_v25, %v26_v27  ;;  %v72_v35 = vmax.f32 %v42_v10, %v46_v17  ;;  %v27_v36 = vld [vmem:[%s672_s0 + $0x90] sm:$0xff]  ;;  %v28_v37 = vld [vmem:[%s672_s0 + $0x98] sm:$0xff]  ;;  %v29_v46 = vld [vmem:[%s672_s0 + $0xa0] sm:$0xff] }
   0x8   :  { %v73_v38 = vmax.f32 %v43_v11, %v47_v18  ;;  %v74_v39 = vmax.f32 %v44_v15, %v48_v22  ;;  %v79_v40 = vmax.f32 %v49_v23, %v53_v30  ;;  %v57_v41 = vmax.f32 %v25_v26, %v27_v36  ;;  %v30_v47 = vld [vmem:[%s672_s0 + $0xa8] sm:$0xff]  ;;  %v548_v56 = vld [vmem:[%s672_s0 + $0xb0] sm:$0xff] }
   0x9   :  { %v80_v42 = vmax.f32 %v50_v24, %v54_v32  ;;  %v529_v43 = vmax.f32 %v51_v28, %v55_v33  ;;  %v531_v44 = vmax.f32 %v52_v29, %v56_v34  ;;  %v58_v45 = vmax.f32 %v26_v27, %v28_v37 }
   0xa   :  { %v97_v48 = vmax.f32 %v71_v31, %v79_v40  ;;  %v75_v49 = vmax.f32 %v45_v16, %v49_v23  ;;  %v76_v50 = vmax.f32 %v46_v17, %v50_v24  ;;  %v539_v51 = vmax.f32 %v53_v30, %v57_v41 }
   0xb   :  { %v98_v52 = vmax.f32 %v72_v35, %v80_v42  ;;  %v99_v53 = vmax.f32 %v73_v38, %v529_v43  ;;  %v100_v54 = vmax.f32 %v74_v39, %v531_v44  ;;  %v543_v55 = vmax.f32 %v54_v32, %v58_v45 }
   0xc   :  { %6 = vsyncpa [#allocation3], 0  ;;  %v101_v57 = vmax.f32 %v75_v49, %v539_v51  ;;  %v551_v58 = vmax.f32 %v27_v36, %v29_v46  ;;  %v553_v59 = vmax.f32 %v28_v37, %v30_v47  ;;  %v77_v60 = vmax.f32 %v47_v18, %v51_v28  ;;  %v558_v61 = vld [vmem:[%s672_s0 + $0xb8] sm:$0xff] }
   0xd   :  { %v115_v62 = vmax.f32 %v97_v48, %v99_v53  ;;  %v116_v63 = vmax.f32 %v98_v52, %v100_v54  ;;  %v102_v0 = vmax.f32 %v76_v50, %v543_v55  ;;  %v78_v1 = vmax.f32 %v48_v22, %v52_v29 }
   0xe   :  { %v117_v2 = vmax.f32 %v99_v53, %v101_v57  ;;  %v562_v3 = vmax.f32 %v55_v33, %v551_v58  ;;  %v565_v4 = vmax.f32 %v56_v34, %v553_v59  ;;  %v568_v5 = vmax.f32 %v29_v46, %v548_v56 }
   0xf   :  { %v148_v6 = vrot.slane %v115_v62, 1  ;;  %v149_v7 = vrot.slane %v116_v63, 1  ;;  %v118_v8 = vmax.f32 %v100_v54, %v102_v0  ;;  %v571_v9 = vmax.f32 %v30_v47, %v558_v61 }
  0x10   :  { %vm293_vm2 = vcmask 1043456   ;;  %v151_v10 = vrot.slane %v117_v2, 1  ;;  %v103_v11 = vmax.f32 %v77_v60, %v562_v3  ;;  %v104_v12 = vmax.f32 %v78_v1, %v565_v4 }
  0x11   :  { %v576_v13 = vmax.f32 %v57_v41, %v568_v5  ;;  %v150_v14 = vsel %vm147_vm0, %v148_v6, %v149_v7  ;;  %v189_v15 = vmax.f32 %v116_v63, %v149_v7  ;;  %v152_v16 = vrot.slane %v118_v8, 1 }
  0x12   :  { %v580_v17 = vmax.f32 %v58_v45, %v571_v9  ;;  %v188_v18 = vmax.f32 %v115_v62, %v150_v14  ;;  %v119_v19 = vmax.f32 %v101_v57, %v103_v11  ;;  %v120_v20 = vmax.f32 %v102_v0, %v104_v12 }
  0x13   :  { %v583_v21 = vmax.f32 %v79_v40, %v576_v13  ;;  %v222_v22 = vrot.slane %v189_v15, 2  ;;  %v153_v23 = vsel %vm147_vm0, %v151_v10, %v152_v16  ;;  %v191_v24 = vmax.f32 %v118_v8, %v152_v16  ;;  %v33_v10 = vld [vmem:[%s672_s0 + $0xc0] sm:$0xff] }
  0x14   :  { %v587_v25 = vmax.f32 %v80_v42, %v580_v17  ;;  %v221_v26 = vrot.slane %v188_v18, 2  ;;  %v190_v27 = vmax.f32 %v117_v2, %v153_v23  ;;  %v154_v28 = vrot.slane %v119_v19, 1 }
  0x15   :  { %v155_v29 = vrot.slane %v120_v20, 1  ;;  %v262_v30 = vmax.f32 %v189_v15, %v222_v22  ;;  %v225_v31 = vrot.slane %v191_v24, 2  ;;  %v121_v32 = vmax.f32 %v103_v11, %v583_v21  ;;  %v34_v11 = vld [vmem:[%s672_s0 + $0xc8] sm:$0xff] }
  0x16   :  { %v122_v33 = vmax.f32 %v104_v12, %v587_v25  ;;  %v223_v34 = vsel %vm220_vm1, %v221_v26, %v222_v22  ;;  %v224_v35 = vrot.slane %v190_v27, 2  ;;  %vm406_vm3 = vcmask 64512  }
  0x17   :  { %v156_v36 = vsel %vm147_vm0, %v154_v28, %v155_v29  ;;  %v193_v37 = vmax.f32 %v120_v20, %v155_v29  ;;  %v261_v38 = vmax.f32 %v188_v18, %v223_v34  ;;  %v295_v39 = vrot.slane %v262_v30, 4 }
  0x18   :  { %v264_v40 = vmax.f32 %v191_v24, %v225_v31  ;;  %v192_v41 = vmax.f32 %v119_v19, %v156_v36  ;;  %v226_v42 = vsel %vm220_vm1, %v224_v35, %v225_v31  ;;  %v157_v46 = vrot.slane %v121_v32, 1 }
  0x19   :  { %v228_v45 = vrot.slane %v193_v37, 2  ;;  %v158_v47 = vrot.slane %v122_v33, 1  ;;  %v294_v48 = vrot.slane %v261_v38, 4  ;;  %v335_v49 = vmax.f32 %v262_v30, %v295_v39 }
  0x1a   :  { %v263_v50 = vmax.f32 %v190_v27, %v226_v42  ;;  %v298_v52 = vrot.slane %v264_v40, 4  ;;  %v227_v53 = vrot.slane %v192_v41, 2  ;;  %v63_v26 = vmax.f32 %v548_v56, %v33_v10  ;;  %v36_v56 = vld [vmem:[%s672_s0 + $0xd8] sm:$0xff] }
  0x1b   :  { %v266_v54 = vmax.f32 %v193_v37, %v228_v45  ;;  %v159_v57 = vsel %vm147_vm0, %v157_v46, %v158_v47  ;;  %v195_v60 = vmax.f32 %v122_v33, %v158_v47  ;;  %v296_v62 = vsel %vm293_vm2, %v294_v48, %v295_v39 }
  0x1c   :  { %v367_v63 = vrot.slane %v335_v49, 1  ;;  %v297_v0 = vrot.slane %v263_v50, 4  ;;  %v337_v1 = vmax.f32 %v264_v40, %v298_v52  ;;  %v334_v2 = vmax.f32 %v261_v38, %v296_v62  ;;  %v37_v40 = vld [vmem:[%s672_s0 + $0xe0] sm:$0xff]  ;;  %v39_v62 = vld [vmem:[%s672_s0 + $0xf0] sm:$0xff] }
  0x1d   :  { %v229_v6 = vsel %vm220_vm1, %v227_v53, %v228_v45  ;;  %v301_v7 = vrot.slane %v266_v54, 4  ;;  %v194_v8 = vmax.f32 %v121_v32, %v159_v57  ;;  %v231_v16 = vrot.slane %v195_v60, 2  ;;  %v35_v32 = vld [vmem:[%s672_s0 + $0xd0] sm:$0xff] }
  0x1e   :  { %v299_v12 = vsel %vm293_vm2, %v297_v0, %v298_v52  ;;  %v370_v14 = vrot.slane %v337_v1, 1  ;;  %v265_v15 = vmax.f32 %v192_v41, %v229_v6  ;;  %v366_v18 = vrot.slane %v334_v2, 1 }
  0x1f   :  { %v336_v19 = vmax.f32 %v263_v50, %v299_v12  ;;  %v339_v20 = vmax.f32 %v266_v54, %v301_v7  ;;  %v230_v22 = vrot.slane %v194_v8, 2  ;;  %v268_v24 = vmax.f32 %v195_v60, %v231_v16 }
  0x20   :  { %v300_v23 = vrot.slane %v265_v15, 4  ;;  %v64_v27 = vmax.f32 %v558_v61, %v34_v11  ;;  %v368_v28 = vsel %vm147_vm0, %v366_v18, %v367_v63  ;;  %v89_v38 = vmax.f32 %v551_v58, %v63_v26  ;;  %v38_v58 = vld [vmem:[%s672_s0 + $0xe8] sm:$0xff] }
  0x21   :  { %v369_v29 = vrot.slane %v336_v19, 1  ;;  %v373_v30 = vrot.slane %v339_v20, 1  ;;  %v232_v31 = vsel %vm220_vm1, %v230_v22, %v231_v16  ;;  %v398_v33 = vmax.f32 %v334_v2, %v368_v28 }
  0x22   :  { %v302_v34 = vsel %vm293_vm2, %v300_v23, %v301_v7  ;;  %v267_v35 = vmax.f32 %v194_v8, %v232_v31  ;;  %v304_v36 = vrot.slane %v268_v24, 4  ;;  %v90_v39 = vmax.f32 %v553_v59, %v64_v27 }
  0x23   :  { %v371_v61 = vsel %vm147_vm0, %v369_v29, %v370_v14  ;;  %v338_v37 = vmax.f32 %v265_v15, %v302_v34  ;;  %407 = vst.msk [vmem:[#allocation2] sm:$0xff] %vm406_vm3, %v398_v33  ;;  %v65_v46 = vmax.f32 %v33_v10, %v35_v32  ;;  %v107_v48 = vmax.f32 %v529_v43, %v89_v38 }
  0x24   :  { %v399_v41 = vmax.f32 %v336_v19, %v371_v61  ;;  %v303_v42 = vrot.slane %v267_v35, 4  ;;  %v341_v45 = vmax.f32 %v268_v24, %v304_v36  ;;  %v108_v49 = vmax.f32 %v531_v44, %v90_v39 }
  0x25   :  { %v372_v47 = vrot.slane %v338_v37, 1  ;;  %v66_v50 = vmax.f32 %v34_v11, %v36_v56  ;;  %v91_v53 = vmax.f32 %v568_v5, %v65_v46  ;;  %v67_v54 = vmax.f32 %v35_v32, %v37_v40  ;;  %v40_v11 = vld [vmem:[%s672_s0 + $0xf8] sm:$0xff]  ;;  %s456_s0 = smov [#allocation2]  }
  0x26   :  { %408 = vst.msk [vmem:[#allocation2 + $0x8] sm:$0xff] %vm406_vm3, %v399_v41  ;;  %v305_v59 = vsel %vm293_vm2, %v303_v42, %v304_v36  ;;  %v376_v52 = vrot.slane %v341_v45, 1  ;;  %v123_v43 = vmax.f32 %v583_v21, %v107_v48  ;;  %v124_v44 = vmax.f32 %v587_v25, %v108_v49  ;;  %s420_s12 = sshll.u32 %s456_s0, 4  ;;  %s421_s12 = int_to_ptr.vmem [resolvable:$true] %s420_s12 }
  0x27   :  { %v374_v57 = vsel %vm147_vm0, %v372_v47, %v373_v30  ;;  %v340_v60 = vmax.f32 %v267_v35, %v305_v59  ;;  %v92_v0 = vmax.f32 %v571_v9, %v66_v50  ;;  %v109_v1 = vmax.f32 %v539_v51, %v91_v53  ;;  %s434_s13 = scalar_lea.vmem %s421_s12, 1024  ;;  %p439_p1 = scmp.lt.s32.totalorder %s421_s12, %s421_s12 }
  0x28   :  { %v400_v63 = vmax.f32 %v338_v37, %v374_v57  ;;  %v68_v2 = vmax.f32 %v36_v56, %v38_v58  ;;  %v160_v5 = vrot.slane %v123_v43, 1  ;;  %v161_v7 = vrot.slane %v124_v44, 1  ;;  %p435_p0 = scmp.ne.s32.totalorder %s421_s12, %s434_s13  ;;  %p440_p2 = scmp.lt.s32.totalorder %s434_s13, %s434_s13 }
  0x29   :  { %v375_v6 = vrot.slane %v340_v60, 1  ;;  %v93_v8 = vmax.f32 %v63_v26, %v67_v54  ;;  %v110_v21 = vmax.f32 %v543_v55, %v92_v0  ;;  %v125_v10 = vmax.f32 %v107_v48, %v109_v1 }
  0x2a   :  { %409 = vst.msk [vmem:[#allocation2 + $0x10] sm:$0xff] %vm406_vm3, %v400_v63  ;;  %v94_v25 = vmax.f32 %v64_v27, %v68_v2  ;;  %v69_v12 = vmax.f32 %v37_v40, %v39_v62  ;;  %v162_v51 = vsel %vm147_vm0, %v160_v5, %v161_v7  ;;  %v197_v14 = vmax.f32 %v124_v44, %v161_v7  ;;  %p441_p3 = por %p440_p2, %p439_p1 }
  0x2b   :  { %v377_v9 = vsel %vm147_vm0, %v375_v6, %v376_v52  ;;  %v111_v15 = vmax.f32 %v562_v3, %v93_v8  ;;  %v196_v18 = vmax.f32 %v123_v43, %v162_v51  ;;  %v126_v19 = vmax.f32 %v108_v49, %v110_v21 }
  0x2c   :  { %v401_v16 = vmax.f32 %v340_v60, %v377_v9  ;;  %v163_v20 = vrot.slane %v125_v10, 1  ;;  %v234_v22 = vrot.slane %v197_v14, 2  ;;  %v112_v55 = vmax.f32 %v565_v4, %v94_v25  ;;  %p442_p4 = pnand %p441_p3, %p435_p0 }
  0x2d   :  { %v127_v23 = vmax.f32 %v109_v1, %v111_v15  ;;  %v70_v24 = vmax.f32 %v38_v58, %v40_v11  ;;  %v233_v26 = vrot.slane %v196_v18, 2  ;;  %v164_v27 = vrot.slane %v126_v19, 1 }
  0x2e   :  { %410 = vst.msk [vmem:[#allocation2 + $0x18] sm:$0xff] %vm406_vm3, %v401_v16  ;;  %v95_v28 = vmax.f32 %v65_v46, %v69_v12  ;;  %v270_v29 = vmax.f32 %v197_v14, %v234_v22  ;;  %v128_v30 = vmax.f32 %v110_v21, %v112_v55 }
  0x2f   :  { %v166_v31 = vrot.slane %v127_v23, 1  ;;  %v96_v32 = vmax.f32 %v66_v50, %v70_v24  ;;  %v235_v3 = vsel %vm220_vm1, %v233_v26, %v234_v22  ;;  %v165_v33 = vsel %vm147_vm0, %v163_v20, %v164_v27 }
  0x30   :  { %v199_v34 = vmax.f32 %v126_v19, %v164_v27  ;;  %v113_v35 = vmax.f32 %v576_v13, %v95_v28  ;;  %v269_v36 = vmax.f32 %v196_v18, %v235_v3  ;;  %v307_v4 = vrot.slane %v270_v29, 4 }
  0x31   :  { %v198_v56 = vmax.f32 %v125_v10, %v165_v33  ;;  %v167_v61 = vrot.slane %v128_v30, 1  ;;  %v114_v38 = vmax.f32 %v580_v17, %v96_v32 }
  0x32   :  { %v237_v37 = vrot.slane %v199_v34, 2  ;;  %v129_v39 = vmax.f32 %v111_v15, %v113_v35  ;;  %v306_v40 = vrot.slane %v269_v36, 4  ;;  %v343_v41 = vmax.f32 %v270_v29, %v307_v4 }
  0x33   :  { %v236_v42 = vrot.slane %v198_v56, 2  ;;  %v168_v45 = vsel %vm147_vm0, %v166_v31, %v167_v61  ;;  %v201_v48 = vmax.f32 %v128_v30, %v167_v61  ;;  %v130_v49 = vmax.f32 %v112_v55, %v114_v38 }
  0x34   :  { %v272_v46 = vmax.f32 %v199_v34, %v237_v37  ;;  %v200_v47 = vmax.f32 %v127_v23, %v168_v45  ;;  %v308_v50 = vsel %vm293_vm2, %v306_v40, %v307_v4  ;;  %v379_v13 = vrot.slane %v343_v41, 1 }
  0x35   :  { %v238_v58 = vsel %vm220_vm1, %v236_v42, %v237_v37  ;;  %v169_v59 = vrot.slane %v129_v39, 1  ;;  %v342_v52 = vmax.f32 %v269_v36, %v308_v50  ;;  %v240_v57 = vrot.slane %v201_v48, 2 }
  0x36   :  { %v271_v53 = vmax.f32 %v198_v56, %v238_v58  ;;  %v310_v54 = vrot.slane %v272_v46, 4  ;;  %v239_v17 = vrot.slane %v200_v47, 2  ;;  %v170_v60 = vrot.slane %v130_v49, 1 }
  0x37   :  { %v378_v43 = vrot.slane %v342_v52, 1  ;;  %v274_v0 = vmax.f32 %v201_v48, %v240_v57 }
  0x38   :  { %v309_v44 = vrot.slane %v271_v53, 4  ;;  %v345_v62 = vmax.f32 %v272_v46, %v310_v54  ;;  %v241_v63 = vsel %vm220_vm1, %v239_v17, %v240_v57  ;;  %v171_v1 = vsel %vm147_vm0, %v169_v59, %v170_v60 }
  0x39   :  { %v203_v2 = vmax.f32 %v130_v49, %v170_v60  ;;  %v380_v6 = vsel %vm147_vm0, %v378_v43, %v379_v13  ;;  %v273_v8 = vmax.f32 %v200_v47, %v241_v63  ;;  %v313_v25 = vrot.slane %v274_v0, 4 }
  0x3a   :  { %v311_v5 = vsel %vm293_vm2, %v309_v44, %v310_v54  ;;  %v382_v7 = vrot.slane %v345_v62, 1  ;;  %v402_v21 = vmax.f32 %v342_v52, %v380_v6  ;;  %v202_v11 = vmax.f32 %v129_v39, %v171_v1 }
  0x3b   :  { %v344_v10 = vmax.f32 %v271_v53, %v311_v5  ;;  %v312_v12 = vrot.slane %v273_v8, 4  ;;  %v243_v9 = vrot.slane %v203_v2, 2  ;;  %v347_v14 = vmax.f32 %v274_v0, %v313_v25 }
  0x3c   :  { %411 = vst.msk [vmem:[#allocation2 + $0x20] sm:$0xff] %vm406_vm3, %v402_v21  ;;  %v242_v15 = vrot.slane %v202_v11, 2 }
  0x3d   :  { %v381_v51 = vrot.slane %v344_v10, 1  ;;  %v314_v16 = vsel %vm293_vm2, %v312_v12, %v313_v25  ;;  %v276_v18 = vmax.f32 %v203_v2, %v243_v9  ;;  %v385_v22 = vrot.slane %v347_v14, 1 }
  0x3e   :  { %v346_v20 = vmax.f32 %v273_v8, %v314_v16  ;;  %v244_v55 = vsel %vm220_vm1, %v242_v15, %v243_v9 }
  0x3f   :  { %v383_v19 = vsel %vm147_vm0, %v381_v51, %v382_v7  ;;  %v275_v24 = vmax.f32 %v202_v11, %v244_v55  ;;  %v316_v26 = vrot.slane %v276_v18, 4 }
  0x40   :  { %v403_v23 = vmax.f32 %v344_v10, %v383_v19  ;;  %v384_v27 = vrot.slane %v346_v20, 1 }
  0x41   :  { %v315_v28 = vrot.slane %v275_v24, 4  ;;  %v349_v29 = vmax.f32 %v276_v18, %v316_v26 }
  0x42   :  { %412 = vst.msk [vmem:[#allocation2 + $0x28] sm:$0xff] %vm406_vm3, %v403_v23  ;;  %v386_v30 = vsel %vm147_vm0, %v384_v27, %v385_v22 }
  0x43   :  { %v404_v31 = vmax.f32 %v346_v20, %v386_v30  ;;  %v317_v32 = vsel %vm293_vm2, %v315_v28, %v316_v26  ;;  %v388_v33 = vrot.slane %v349_v29, 1 }
  0x44   :  { %v348_v3 = vmax.f32 %v275_v24, %v317_v32 }
  0x45   :  { %413 = vst.msk [vmem:[#allocation2 + $0x30] sm:$0xff] %vm406_vm3, %v404_v31 }
  0x46   :  { %v387_v34 = vrot.slane %v348_v3, 1 }
  0x48   :  { %v389_v35 = vsel %vm147_vm0, %v387_v34, %v388_v33 }
  0x49   :  { %v405_v36 = vmax.f32 %v348_v3, %v389_v35 }
  0x4b   :  { %414 = vst.msk [vmem:[#allocation2 + $0x38] sm:$0xff] %vm406_vm3, %v405_v36 }
  0x4c   :  { %445 = shalt.err (!%p442_p4)
}
  0x4d   :  { %s457_s14 = smov 128   ;;  %s458_s15 = smov 8  }
  0x4e   :  { %426 = dma.vmem_to_hbm [thread:$0]  %s421_s12, 1024, %s673_s1, [#allocation3], %s457_s14, %s457_s14, %s458_s15  }
  0x4f   :  { %454 = dma.done.wait [#allocation3], 1024  }
  0x50   :  { %455 = vsyncadd [#allocation3], 4294966272 }
  0x51   :  { %430 = vsyncpa [#allocation3], 1 }

</bundles_post_ra>
